<compile_context>
chip_gen: v7x
topology: tpu7x:2x2x1
jax: 0.10.0
libtpu: 0.0.40
codegen_flags: <defaults>
</compile_context>

<pallas_src>
import jax
import jax.numpy as jnp
from jax.experimental import pallas as pl
from jax.experimental.pallas import tpu as pltpu


def _round_up(n, m):
    return ((n + m - 1) // m) * m


def _layer_norm_epilogue(h, g, beta, d_logical, d_padded, eps):
    """LayerNorm over the logical feature dim of an f32 (tm, Dp) tile."""
    inv_d = 1.0 / float(d_logical)            # Python float: no captured const
    if d_padded != d_logical:
        col = jax.lax.broadcasted_iota(jnp.int32, (1, d_padded), 1)
        h = jnp.where(col < d_logical, h, 0.0)
    # Two independent cross-lane reductions (no serial mean -> centered dep).
    s1 = jnp.sum(h, axis=-1, keepdims=True)
    s2 = jnp.sum(h * h, axis=-1, keepdims=True)
    mean = s1 * inv_d
    var = jnp.maximum(s2 * inv_d - mean * mean, 0.0)   # biased variance
    y = (h - mean) * jax.lax.rsqrt(var + eps)
    return y * g + beta


def _make_fused_kernel(d_logical, d_padded, eps, gemm_dtype):
    """Single-k-step kernel: W fully resident in VMEM."""
    def kernel(x_ref, w_ref, b_ref, g_ref, beta_ref, o_ref):
        xv = x_ref[...]                                      # load x tile once
        s = jnp.dot(xv.astype(gemm_dtype), w_ref[...],
                    preferred_element_type=jnp.float32)
        h = xv.astype(jnp.float32) + s + b_ref[...]          # residual + bias
        y = _layer_norm_epilogue(h, g_ref[...], beta_ref[...],
                                 d_logical, d_padded, eps)
        o_ref[...] = y.astype(o_ref.dtype)
    return kernel


def _make_ktiled_kernel(d_logical, d_padded, tk, eps, gemm_dtype):
    """K-tiled kernel: W streamed in (tk, Dp) blocks, f32 VMEM accumulator."""
    def kernel(x_ref, w_ref, b_ref, g_ref, beta_ref, o_ref, acc_ref):
        k = pl.program_id(1)

        @pl.when(k == 0)
        def _():
            acc_ref[...] = jnp.zeros_like(acc_ref)

        off = pl.multiple_of(k * tk, tk)
        xk = x_ref[:, pl.ds(off, tk)]
        acc_ref[...] += jnp.dot(xk.astype(gemm_dtype), w_ref[...],
                                preferred_element_type=jnp.float32)

        @pl.when(k == pl.num_programs(1) - 1)
        def _():
            h = x_ref[...].astype(jnp.float32) + acc_ref[...] + b_ref[...]
            y = _layer_norm_epilogue(h, g_ref[...], beta_ref[...],
                                     d_logical, d_padded, eps)
            o_ref[...] = y.astype(o_ref.dtype)
    return kernel


def residual_layer_norm(x, w, b, gamma, beta, *, tm=None, eps=1e-5,
                        gemm_dtype=jnp.bfloat16):
    """LayerNorm(x + (x @ w + b)) with x: (B, S, D).

    The sublayer is a deterministic Linear(d_model -> d_model); dropout uses
    eval-mode (identity) semantics.
    """
    B, S, D = x.shape
    rows = B * S

    # Lane-dense feature dim.
    Dp = max(128, _round_up(D, 128))

    # Row tile: multiple of sublane packing; bigger tiles for small Dp.
    sub = 16 if x.dtype == jnp.bfloat16 else 8
    if tm is None:
        tm = 512 if Dp <= 1024 else 256
    tm_eff = min(_round_up(tm, sub), _round_up(rows, sub))
    # Keep >= 2 row-grid steps when rows allow (v7x has 2 TCs on the
    # "parallel" axis; a 1-step grid idles one of them).
    if rows >= 2 * sub and _round_up(rows, tm_eff) // tm_eff < 2:
        tm_eff = _round_up((rows + 1) // 2, sub)
    rows_p = _round_up(rows, tm_eff)

    # Generation-aware VMEM capacity (fallback ~ v5e/v6e).
    try:
        vmem_cap = int(pltpu.get_tpu_info().vmem_capacity_bytes)
    except Exception:  # capability probe only
        vmem_cap = 128 << 20

    w_item = jnp.dtype(gemm_dtype).itemsize
    x_item = jnp.dtype(x.dtype).itemsize

    # Resident W unless its (double-buffered) footprint eats >~40% of VMEM;
    # then stream it along a K-reduction grid axis.
    resident_w_bytes = 2 * Dp * Dp * w_item
    if resident_w_bytes > int(0.4 * vmem_cap):
        tk = next((t for t in (1024, 512, 256, 128) if Dp % t == 0), Dp)
    else:
        tk = Dp
    n_k = Dp // tk

    # --- operand preparation (skip pad / slice when already aligned) -------
    x2 = x.reshape(rows, D)
    needs_pad = (rows_p != rows) or (Dp != D)
    if needs_pad:
        x2 = jnp.pad(x2, ((0, rows_p - rows), (0, Dp - D)))
    wp = w.astype(gemm_dtype)
    if Dp != D:
        wp = jnp.pad(wp, ((0, Dp - D), (0, Dp - D)))
    bp = jnp.pad(b.astype(jnp.float32), (0, Dp - D)).reshape(1, Dp)
    gp = jnp.pad(gamma.astype(jnp.float32), (0, Dp - D)).reshape(1, Dp)
    betap = jnp.pad(beta.astype(jnp.float32), (0, Dp - D)).reshape(1, Dp)

    # --- VMEM budget --------------------------------------------------------
    working = (2 * tm_eff * Dp * x_item        # x tiles (double buffered)
               + 2 * tm_eff * Dp * x_item      # out tiles
               + 2 * tk * Dp * w_item          # W blocks
               + 5 * tm_eff * Dp * 4           # f32 accumulator + epilogue temps
               + 8 * Dp * 4)                   # b / gamma / beta
    vmem_limit = int(min(max(working + (8 << 20), 32 << 20),
                         int(0.75 * vmem_cap)))

    # --- kernel + specs ------------------------------------------------------
    if n_k == 1:
        kernel = _make_fused_kernel(D, Dp, eps, gemm_dtype)
        grid = (rows_p // tm_eff,)
        in_specs = [
            pl.BlockSpec((tm_eff, Dp), lambda i: (i, 0)),    # x rows (streamed)
            pl.BlockSpec((Dp, Dp), lambda i: (0, 0)),        # W (resident)
            pl.BlockSpec((1, Dp), lambda i: (0, 0)),         # b
            pl.BlockSpec((1, Dp), lambda i: (0, 0)),         # gamma
            pl.BlockSpec((1, Dp), lambda i: (0, 0)),         # beta
        ]
        out_specs = pl.BlockSpec((tm_eff, Dp), lambda i: (i, 0))
        scratch_shapes = []
        dim_sem = ("parallel",)
    else:
        kernel = _make_ktiled_kernel(D, Dp, tk, eps, gemm_dtype)
        grid = (rows_p // tm_eff, n_k)
        in_specs = [
            pl.BlockSpec((tm_eff, Dp), lambda i, k: (i, 0)), # x rows (k-invariant)
            pl.BlockSpec((tk, Dp), lambda i, k: (k, 0)),     # W streamed over k
            pl.BlockSpec((1, Dp), lambda i, k: (0, 0)),      # b
            pl.BlockSpec((1, Dp), lambda i, k: (0, 0)),      # gamma
            pl.BlockSpec((1, Dp), lambda i, k: (0, 0)),      # beta
        ]
        out_specs = pl.BlockSpec((tm_eff, Dp), lambda i, k: (i, 0))
        scratch_shapes = [pltpu.VMEM((tm_eff, Dp), jnp.float32)]
        dim_sem = ("parallel", "arbitrary")

    out = pl.pallas_call(
        kernel,
        out_shape=jax.ShapeDtypeStruct((rows_p, Dp), x.dtype),
        grid_spec=pltpu.PrefetchScalarGridSpec(
            num_scalar_prefetch=0,
            grid=grid,
            in_specs=in_specs,
            out_specs=out_specs,
            scratch_shapes=scratch_shapes,
        ),
        compiler_params=pltpu.CompilerParams(
            dimension_semantics=dim_sem,
            vmem_limit_bytes=vmem_limit,
        ),
    )(x2, wp, bp, gp, betap)

    if needs_pad:
        out = out[:rows, :D]
    return out.reshape(B, S, D)


if __name__ == "__main__":
    B, S, D = 2, 8, 32  # batch=2, seq=8, d_model=32

    key = jax.random.PRNGKey(0)
    kx, kw, kb = jax.random.split(key, 3)

    x = jax.random.normal(kx, (B, S, D), dtype=jnp.float32)
    # deterministic sublayer (Linear d_model -> d_model) parameters
    w = jax.random.normal(kw, (D, D), dtype=jnp.float32) * 0.05
    b = jax.random.normal(kb, (D,), dtype=jnp.float32) * 0.01
    # LayerNorm affine params (PyTorch default init)
    gamma = jnp.ones((D,), dtype=jnp.float32)
    beta = jnp.zeros((D,), dtype=jnp.float32)

    out = residual_layer_norm(x, w, b, gamma, beta)
    jax.block_until_ready(out)

    # Reference with the same bf16-input / f32-accumulate GEMM as the kernel.
    s = jnp.dot(x.reshape(-1, D).astype(jnp.bfloat16), w.astype(jnp.bfloat16),
                preferred_element_type=jnp.float32).reshape(B, S, D)
    h = x + s + b
    mean = h.mean(-1, keepdims=True)
    var = ((h - mean) ** 2).mean(-1, keepdims=True)
    ref = (h - mean) / jnp.sqrt(var + 1e-5) * gamma + beta

    err = float(jnp.max(jnp.abs(out - ref)))
    assert jnp.allclose(out, ref, atol=5e-3, rtol=5e-3), err

    print("KERNEL_OK")
</pallas_src>

<mosaic_0001>
module attributes {stable_mosaic.version = 11 : i64} {
  func.func @kernel(%arg0: i32, %arg1: memref<8x128xf32, #tpu.memory_space<vmem>>, %arg2: memref<128x128xbf16, #tpu.memory_space<vmem>>, %arg3: memref<1x128xf32, #tpu.memory_space<vmem>>, %arg4: memref<1x128xf32, #tpu.memory_space<vmem>>, %arg5: memref<1x128xf32, #tpu.memory_space<vmem>>, %arg6: memref<8x128xf32, #tpu.memory_space<vmem>>) attributes {dimension_semantics = [#tpu.dimension_semantics<parallel>], iteration_bounds = array<i64: 2>, scalar_prefetch = 0 : i64, scratch_operands = 0 : i64, tpu.core_type = #tpu.core_type<tc>, window_params = [{transform_indices = @transform_0, window_bounds = array<i64: 8, 128>}, {pipeline_mode = #tpu.pipeline_mode<synchronous>, transform_indices = @transform_1, window_bounds = array<i64: 128, 128>}, {pipeline_mode = #tpu.pipeline_mode<synchronous>, transform_indices = @transform_2, window_bounds = array<i64: 1, 128>}, {pipeline_mode = #tpu.pipeline_mode<synchronous>, transform_indices = @transform_3, window_bounds = array<i64: 1, 128>}, {pipeline_mode = #tpu.pipeline_mode<synchronous>, transform_indices = @transform_4, window_bounds = array<i64: 1, 128>}, {transform_indices = @transform_5, window_bounds = array<i64: 8, 128>}]} {
    %c0 = arith.constant 0 : index
    %c0_0 = arith.constant 0 : index
    %0 = vector.load %arg1[%c0, %c0_0] : memref<8x128xf32, #tpu.memory_space<vmem>>, vector<8x128xf32>
    %1 = arith.truncf %0 : vector<8x128xf32> to vector<8x128xbf16>
    %c0_1 = arith.constant 0 : index
    %c0_2 = arith.constant 0 : index
    %2 = vector.load %arg2[%c0_1, %c0_2] : memref<128x128xbf16, #tpu.memory_space<vmem>>, vector<128x128xbf16>
    %cst = arith.constant dense<0.000000e+00> : vector<8x128xf32>
    %3 = tpu.matmul %1, %2, %cst {dimension_numbers = #tpu.dot_dimension_numbers<[1], [0], [0], [1], [0, 0, 1, 1], [], []>} : vector<8x128xbf16>, vector<128x128xbf16>, vector<8x128xf32> -> vector<8x128xf32>
    %4 = arith.addf %0, %3 : vector<8x128xf32>
    %c0_3 = arith.constant 0 : index
    %c0_4 = arith.constant 0 : index
    %5 = vector.load %arg3[%c0_3, %c0_4] : memref<1x128xf32, #tpu.memory_space<vmem>>, vector<1x128xf32>
    %6 = vector.broadcast %5 : vector<1x128xf32> to vector<8x128xf32>
    %7 = arith.addf %4, %6 : vector<8x128xf32>
    %c0_5 = arith.constant 0 : index
    %c0_6 = arith.constant 0 : index
    %8 = vector.load %arg4[%c0_5, %c0_6] : memref<1x128xf32, #tpu.memory_space<vmem>>, vector<1x128xf32>
    %c0_7 = arith.constant 0 : index
    %c0_8 = arith.constant 0 : index
    %9 = vector.load %arg5[%c0_7, %c0_8] : memref<1x128xf32, #tpu.memory_space<vmem>>, vector<1x128xf32>
    %10 = tpu.iota {dimensions = array<i32: 1>} : vector<1x128xi32>
    %c32_i32 = arith.constant 32 : i32
    %11 = vector.broadcast %c32_i32 : i32 to vector<1x128xi32>
    %12 = arith.cmpi slt, %10, %11 : vector<1x128xi32>
    %cst_9 = arith.constant 0.000000e+00 : f32
    %13 = vector.shape_cast %12 : vector<1x128xi1> to vector<1x128xi1>
    %14 = vector.broadcast %13 : vector<1x128xi1> to vector<8x128xi1>
    %15 = vector.broadcast %cst_9 : f32 to vector<8x128xf32>
    %16 = arith.select %14, %7, %15 : vector<8x128xi1>, vector<8x128xf32>
    %cst_10 = arith.constant dense<0.000000e+00> : vector<8xf32>
    %17 = vector.multi_reduction <add>, %16, %cst_10 [1] : vector<8x128xf32> to vector<8xf32>
    %18 = vector.shape_cast %17 : vector<8xf32> to vector<8x1xf32>
    %19 = arith.mulf %16, %16 : vector<8x128xf32>
    %cst_11 = arith.constant dense<0.000000e+00> : vector<8xf32>
    %20 = vector.multi_reduction <add>, %19, %cst_11 [1] : vector<8x128xf32> to vector<8xf32>
    %21 = vector.shape_cast %20 : vector<8xf32> to vector<8x1xf32>
    %cst_12 = arith.constant 3.125000e-02 : f32
    %22 = vector.broadcast %cst_12 : f32 to vector<8x1xf32>
    %23 = arith.mulf %18, %22 : vector<8x1xf32>
    %cst_13 = arith.constant 3.125000e-02 : f32
    %24 = vector.broadcast %cst_13 : f32 to vector<8x1xf32>
    %25 = arith.mulf %21, %24 : vector<8x1xf32>
    %26 = arith.mulf %23, %23 : vector<8x1xf32>
    %27 = arith.subf %25, %26 : vector<8x1xf32>
    %cst_14 = arith.constant 0.000000e+00 : f32
    %28 = vector.broadcast %cst_14 : f32 to vector<8x1xf32>
    %29 = arith.maximumf %27, %28 : vector<8x1xf32>
    %30 = vector.broadcast %23 : vector<8x1xf32> to vector<8x128xf32>
    %31 = arith.subf %16, %30 : vector<8x128xf32>
    %cst_15 = arith.constant 9.99999974E-6 : f32
    %32 = vector.broadcast %cst_15 : f32 to vector<8x1xf32>
    %33 = arith.addf %29, %32 : vector<8x1xf32>
    %34 = math.rsqrt %33 : vector<8x1xf32>
    %35 = vector.broadcast %34 : vector<8x1xf32> to vector<8x128xf32>
    %36 = arith.mulf %31, %35 : vector<8x128xf32>
    %37 = vector.broadcast %8 : vector<1x128xf32> to vector<8x128xf32>
    %38 = arith.mulf %36, %37 : vector<8x128xf32>
    %39 = vector.broadcast %9 : vector<1x128xf32> to vector<8x128xf32>
    %40 = arith.addf %38, %39 : vector<8x128xf32>
    %c0_16 = arith.constant 0 : index
    %c0_17 = arith.constant 0 : index
    %41 = vector.load %arg6[%c0_16, %c0_17] : memref<8x128xf32, #tpu.memory_space<vmem>>, vector<8x128xf32>
    tpu.vector_store %arg6[%c0_16, %c0_17], %40 {strides = array<i32>} : memref<8x128xf32, #tpu.memory_space<vmem>>, vector<8x128xf32>,
    return
  }
  func.func @transform_0(%arg0: i32) -> (i32, i32) {
    %c0_i32 = arith.constant 0 : i32
    %c0_i32_0 = arith.constant 0 : i32
    return %arg0, %c0_i32 : i32, i32
  }
  func.func @transform_1(%arg0: i32) -> (i32, i32) {
    %c0_i32 = arith.constant 0 : i32
    %c0_i32_0 = arith.constant 0 : i32
    %c0_i32_1 = arith.constant 0 : i32
    return %c0_i32, %c0_i32_0 : i32, i32
  }
  func.func @transform_2(%arg0: i32) -> (i32, i32) {
    %c0_i32 = arith.constant 0 : i32
    %c0_i32_0 = arith.constant 0 : i32
    %c0_i32_1 = arith.constant 0 : i32
    return %c0_i32, %c0_i32_0 : i32, i32
  }
  func.func @transform_3(%arg0: i32) -> (i32, i32) {
    %c0_i32 = arith.constant 0 : i32
    %c0_i32_0 = arith.constant 0 : i32
    %c0_i32_1 = arith.constant 0 : i32
    return %c0_i32, %c0_i32_0 : i32, i32
  }
  func.func @transform_4(%arg0: i32) -> (i32, i32) {
    %c0_i32 = arith.constant 0 : i32
    %c0_i32_0 = arith.constant 0 : i32
    %c0_i32_1 = arith.constant 0 : i32
    return %c0_i32, %c0_i32_0 : i32, i32
  }
  func.func @transform_5(%arg0: i32) -> (i32, i32) {
    %c0_i32 = arith.constant 0 : i32
    %c0_i32_0 = arith.constant 0 : i32
    return %arg0, %c0_i32 : i32, i32
  }
}

</mosaic_0001>

<bundles_post_ra>
// kernel: tpu_custom_call.1
= control target key start
LH: loop header
LB: loop body
LE: loop exit
PB: predicated region body
PF: predicated region fallthrough
CT: control target
= control target key end

     0   :  { %10 = vsyncpa [#allocation3], 0  ;;  %s1003_s0 = inlined_call_operand.hbm [shape: f32[16,128], index: 0, kind: input, shape index: {}]   ;;  %s1004_s1 = inlined_call_operand.hbm [shape: bf16[128,128], index: 1, kind: input, shape index: {}]   ;;  %s1005_s2 = inlined_call_operand.vmem [shape: f32[1,128], index: 2, kind: input, shape index: {}]   ;;  %s1006_s3 = inlined_call_operand.vmem [shape: f32[1,128], index: 3, kind: input, shape index: {}]   ;;  %s1007_s4 = inlined_call_operand.vmem [shape: f32[1,128], index: 4, kind: input, shape index: {}]   ;;  %s1008_s5 = inlined_call_operand.hbm [shape: f32[16,128], index: 5, kind: output, shape index: {}]  }
   0x1   :  { %12 = vsyncpa [#allocation3 + $0x1], 0 }
   0x2   :  { %13 = vsyncpa [#allocation6], 0 }
   0x3   :  { %14 = vsyncpa [#allocation4], 0 }
   0x4   :  { %16 = vsyncpa [#allocation4 + $0x1], 0  ;;  %s794_s18 = smov 0   ;;  %s796_s19 = smov 0  }
   0x5   :  { %s798_s20 = smov 0   ;;  %s800_s21 = smov 0  }
   0x6 LB: > { %s815_s22 = sadd.s32 4294967295, %s755_s21   ;;  %s502_s23 = sadd.s32 4294967294, %s755_s21   ;;  %s755_s21 = sphi %s800_s21, %s1028_s21   ;;  %s751_s20 = sphi %s798_s20, %s1027_s20   ;;  %s747_s19 = sphi %s796_s19, %s1026_s19   ;;  %s743_s18 = sphi %s794_s18, %s1025_s18  }
   0x7   : > { %p42_p0 = scmp.ne.s32.totalorder %s747_s19, %s743_s18  ;;  %p1009_p1 = scmp.eq.s32.totalorder %s815_s22, 0 }
   0x8   : > { %p156_p3 = scmp.eq.s32.totalorder %s502_s23, 1  ;;  %p503_p5 = scmp.ge.s32.totalorder %s755_s21, 1 }
   0x9   : > { %p824_p4 = por %p1009_p1, %p42_p0  ;;  %p163_p7 = scmp.lt.s32.totalorder %s755_s21, 3 }
   0xa   : > { %p829_p6 = por %p156_p3, %p42_p0  ;;  %s757_s27 = smov [#allocation5]  }
   0xb   : > { %s1012_s24 = scalar_select %p824_p4, 1, 0 }
   0xc   : > { %s1013_s25 = scalar_select %p829_p6, 1, 0 }
   0xd   : > { %p834_p8 = pnand %p503_p5, %p163_p7  ;;  %s175_s28 = sshll.u32 %s757_s27, 4  ;;  %s838_s28 = int_to_ptr.vmem [resolvable:$true] %s175_s28 }
   0xe   : > { %s850_s30 = sadd.s32 1, %s755_s21   ;;  %s29_s6 = sadd.s32 1, %s751_s20 }
   0xf   : > { %s1014_s26 = scalar_select %p834_p8, 1, 0 }
  0x10   : > { %p564_p9 = pneg %p834_p8  ;;  %s26_s7 = ssub.s32 %s755_s21, %s850_s30 }
  0x11   : > { %s627_s10 = scalar_lea.hbm %s1004_s1, 1024 }
  0x12   : > { %p845_p11 = pnand %p564_p9, %p1009_p1  ;;  %p628_p12 = scmp.ne.s32.totalorder %s1004_s1, %s627_s10 }
  0x13   : > { %p634_p5 = scmp.lt.u32.totalorder %s627_s10, %s1004_s1 }
  0x14   : > { %p629_p13 = pneg %p845_p11 }
  0x16   : > { %p630_p0 = pnand %p629_p13, %p628_p12 }
  0x18   : > { %p631_p3 = pneg %p630_p0 }
  0x1a   : > { %p636_p7 = pnand %p634_p5, %p631_p3 }
  0x1c   : > { %639 = shalt.err (!%p636_p7)
}
  0x1d   : > { %s640_s15 = scalar_lea.vmem %s838_s28, 1024  ;;  %p648_p2 = scmp.lt.s32.totalorder %s838_s28, %s838_s28 }
  0x1e   : > { %p641_p9 = scmp.ne.s32.totalorder %s838_s28, %s640_s15  ;;  %p649_p6 = scmp.lt.s32.totalorder %s640_s15, %s640_s15 }
  0x20   : > { %p643_p10 = pnand %p641_p9, %p629_p13  ;;  %p650_p4 = por %p649_p6, %p648_p2 }
  0x22   : > { %p644_p1 = pneg %p643_p10 }
  0x24   : > { %p651_p8 = pnand %p650_p4, %p644_p1 }
  0x26   : > { %654 = shalt.err (!%p651_p8)
}
  0x27   : > { %s758_s16 = smov 64   ;;  %s759_s17 = smov 4  }
  0x28   : > { %567 = dma.hbm_to_vmem [thread:$0]  (!%p845_p11), %s1004_s1, 1024, %s838_s28, [#allocation6], %s758_s16, %s758_s16, %s759_s17  }
  0x29   : > { %p27_p2 = scmp.eq.s32.totalorder %s26_s7, 0  ;;  %p36_p1 = scmp.ne.s32.totalorder %s751_s20, %s747_s19 }
  0x2a   : > { %p37_p4 = scmp.eq.s32.totalorder %s755_s21, 0  ;;  %p577_p6 = scmp.lt.s32.totalorder %s755_s21, 2 }
  0x2b   : > { %s881_s8 = scalar_select %p27_p2, %s751_s20, %s29_s6  }
  0x2c   : > { %p38_p8 = por %p37_p4, %p36_p1  ;;  %p1016_p10 = scmp.eq.s32.totalorder %s815_s22, 1 }
  0x2d   : > { %s198_s10 = sand.u32 1, %s751_s20   ;;  %s507_s11 = sshll.u32 %s755_s21, 7 }
  0x2e   : > { %p885_p12 = por %p1016_p10, %p36_p1  ;;  %s506_s12 = sshll.u32 %s198_s10, 3 }
  0x2f   : > { %s894_s14 = scalar_lea.hbm %s1003_s0, %s507_s11  ;;  %s202_s28 = scalar_lea.vmem [#allocation2], %s506_s12 }
  0x30   : > { %s209_s6 = sshll.u32 %s202_s28, 4  ;;  %p896_p11 = pnand %p577_p6, %p38_p8  ;;  %s900_s6 = int_to_ptr.vmem [resolvable:$true] %s209_s6 }
  0x31   : > { %s199_s15 = scalar_lea.sflag [#allocation3], %s198_s10  ;;  %s655_s16 = scalar_lea.hbm %s894_s14, 128 }
  0x32   : > { %p656_p13 = scmp.ne.s32.totalorder %s894_s14, %s655_s16  ;;  %p657_p0 = pneg %p896_p11 }
  0x33   : > { %s660_s27 = scalar_lea.hbm %s1003_s0, 256  ;;  %p661_p7 = scmp.lt.u32.totalorder %s894_s14, %s1003_s0 }
  0x34   : > { %p658_p3 = pnand %p657_p0, %p656_p13  ;;  %p662_p9 = scmp.lt.u32.totalorder %s660_s27, %s655_s16 }
  0x35   : > { %p664_p1 = scmp.lt.u32.totalorder %s655_s16, %s894_s14 }
  0x36   : > { %p659_p5 = pneg %p658_p3  ;;  %p663_p2 = por %p662_p9, %p661_p7 }
  0x38   : > { %p665_p4 = por %p664_p1, %p663_p2 }
  0x3a   : > { %p666_p6 = pnand %p665_p4, %p659_p5 }
  0x3c   : > { %669 = shalt.err (!%p666_p6)
}
  0x3d   : > { %s670_s10 = scalar_lea.vmem %s900_s6, 128  ;;  %s760_s29 = smov [#allocation2]  }
  0x3e   : > { %p671_p8 = scmp.ne.s32.totalorder %s900_s6, %s670_s10  ;;  %s675_s13 = sshll.u32 %s760_s29, 4  ;;  %s676_s13 = int_to_ptr.vmem [resolvable:$false] %s675_s13 }
  0x3f   : > { %s677_s28 = scalar_lea.vmem %s676_s13, 256  ;;  %p678_p3 = scmp.lt.s32.totalorder %s900_s6, %s676_s13 }
  0x40   : > { %p673_p10 = pnand %p671_p8, %p657_p0  ;;  %p679_p7 = scmp.lt.s32.totalorder %s677_s28, %s670_s10 }
  0x42   : > { %p674_p13 = pneg %p673_p10  ;;  %p680_p9 = por %p679_p7, %p678_p3 }
  0x44   : > { %p681_p2 = pnand %p680_p9, %p674_p13 }
  0x46   : > { %684 = shalt.err (!%p681_p2)
}
  0x47   : > { %571 = dma.hbm_to_vmem [thread:$0]  (!%p896_p11), %s894_s14, 128, %s900_s6, %s199_s15  }
  0x48   : > { %p1019_p5 = scmp.ne.s32.totalorder %s1014_s26, 0 }
  0x49   : > { %s930_s16 = sand.u32 (!%p1019_p5), 1, %s747_s19   ;;  %p1020_p0 = scmp.ne.s32.totalorder (!%p1019_p5), %s1012_s24, 0 }
  0x4a   : > { %218 = sbr.rel (%p1019_p5) target bundleno = 520 (0x208), region = 40  ;;  %s509_s17 = sshll.u32 (!%p1019_p5), %s930_s16, 3 }
  0x4b   : > { %s221_s23 = scalar_lea.sflag (!%p1019_p5), [#allocation3], %s930_s16  ;;  %s224_s27 = scalar_lea.vmem (!%p1019_p5), [#allocation2], %s509_s17 }
  0x51   : > { %730 = dma.done.wait (%p1020_p0), %s221_s23, 128  }
  0x52   : > { %732 = vsyncadd (%p1020_p0), %s221_s23, 4294967168  ;;  %p1021_p11 = scmp.eq.s32.totalorder %s815_s22, 0 }
  0x54   : > { %734 = dma.done.wait (%p1021_p11), [#allocation6], 1024   ;;  %p1022_p1 = pmov %p1021_p11 }
  0x55   : > { %v761_v0 = vmov 0.0   ;;  %vm762_vm0 = vmmov 0   ;;  %v617_v1 = vld [vmem:[#allocation5] sm:$0xff]   ;;  %v618_v2 = vld [vmem:[#allocation5 + $0x8] sm:$0xff]   ;;  %v619_v3 = vld [vmem:[#allocation5 + $0x10] sm:$0xff]   ;;  %v373_v11 = vlaneseq  ;;  %s524_s11 = sshll.u32 %s815_s22, 7 }
  0x56   : > { %736 = vsyncadd (%p1022_p1), [#allocation6], 4294966272  ;;  %536 = vmatprep.subr.bf16.mxu0 %v761_v0  ;;  %552 = vmatprep.mubr.msk.bf16.mxu0 %vm762_vm0, %v761_v0  ;;  %v620_v4 = vld [vmem:[#allocation5 + $0x18] sm:$0xff]   ;;  %v621_v5 = vld [vmem:[#allocation5 + $0x20] sm:$0xff]   ;;  %s254_s12 = scalar_lea.vmem [#allocation7], %s509_s17  ;;  %s959_s28 = scalar_lea.hbm %s1008_s5, %s524_s11 }
  0x57   : > { %537 = vmatpush3.bf16.msra.mxu0 %v617_v1  ;;  %v622_v6 = vld [vmem:[#allocation5 + $0x28] sm:$0xff]   ;;  %v623_v7 = vld [vmem:[#allocation5 + $0x30] sm:$0xff]   ;;  %v624_v8 = vld [vmem:[#allocation5 + $0x38] sm:$0xff]   ;;  %v374_v12 = vand.u32 127, %v373_v11  ;;  %s422_s10 = sshll.u32 %s254_s12, 4  ;;  %s409_s23 = scalar_lea.sflag [#allocation4], %s930_s16  ;;  %s961_s10 = int_to_ptr.vmem [resolvable:$true] %s422_s10 }
  0x58   : > { %538 = vmatprep.subr.bf16.mxu0 %v761_v0  ;;  %v256_v9 = vld [vmem:[%s224_s27] sm:$0xff]  ;;  %s685_s27 = scalar_lea.vmem %s961_s10, 128  ;;  %s763_s22 = smov [#allocation7]  }
  0x59   : > { %v257_v10 = vpack.c.bf16 %v256_v9, %v256_v9  ;;  %v520_v14 = vld [vmem:[%s1005_s2] ss:$0 sm:$0xff]  ;;  %vm375_vm1 = vcmp.lt.s32.totalorder %v374_v12, 32  ;;  %p686_p4 = scmp.ne.s32.totalorder %s961_s10, %s685_s27  ;;  %s689_s17 = sshll.u32 %s763_s22, 4  ;;  %s690_s17 = int_to_ptr.vmem [resolvable:$false] %s689_s17 }
  0x5a   : > { %v521_v32 = vld [vmem:[%s1006_s3] ss:$0 sm:$0xff]  ;;  %s691_s24 = scalar_lea.vmem %s690_s17, 256  ;;  %p692_p10 = scmp.lt.s32.totalorder %s961_s10, %s690_s17 }
  0x5b   : > { %539 = vmatpush3.bf16.msra.mxu0 %v618_v2  ;;  %v522_v34 = vld [vmem:[%s1007_s4] ss:$0 sm:$0xff]  ;;  %p687_p6 = pnand %p686_p4, %p885_p12  ;;  %p693_p13 = scmp.lt.s32.totalorder %s691_s24, %s685_s27 }
  0x5c   : > { %540 = vmatprep.subr.bf16.mxu0 %v761_v0 }
  0x5d   : > { %p688_p8 = pneg %p687_p6  ;;  %p694_p3 = por %p693_p13, %p692_p10 }
  0x5f   : > { %541 = vmatpush3.bf16.msra.mxu0 %v619_v3  ;;  %p695_p7 = pnand %p694_p3, %p688_p8 }
  0x60   : > { %542 = vmatprep.subr.bf16.mxu0 %v761_v0 }
  0x63   : > { %543 = vmatpush3.bf16.msra.mxu0 %v620_v4 }
  0x64   : > { %544 = vmatprep.subr.bf16.mxu0 %v761_v0 }
  0x67   : > { %545 = vmatpush3.bf16.msra.mxu0 %v621_v5 }
  0x68   : > { %546 = vmatprep.subr.bf16.mxu0 %v761_v0 }
  0x6b   : > { %547 = vmatpush3.bf16.msra.mxu0 %v622_v6 }
  0x6c   : > { %548 = vmatprep.subr.bf16.mxu0 %v761_v0 }
  0x6f   : > { %549 = vmatpush3.bf16.msra.mxu0 %v623_v7 }
  0x70   : > { %550 = vmatprep.subr.bf16.mxu0 %v761_v0 }
  0x73   : > { %551 = vmatpush3.bf16.msra.mxu0 %v624_v8 }
  0x76   : > { %553 = vmatmul.mubr.bf16.vlgmr.msra.gmra.mrb[0].mxu0 %v257_v10 }
 0x149   : > { %v356_v13 = vpop.f32.mrb[0].mxu0 }
 0x14a   : > { %v362_v15 = vadd.f32 %v356_v13, %v256_v9  ;;  %v554_v16 = vpop.f32.mrb[1].mxu0 }
 0x14b   : > { %v359_v17 = vpop.f32.mrb[2].mxu0 }
 0x14c   : > { %v370_v18 = vadd.f32 %v520_v14, %v362_v15  ;;  %v555_v19 = vpop.f32.mrb[3].mxu0 }
 0x14e   : > { %v378_v20 = vsel %vm375_vm1, %v370_v18, 0.0 }
 0x14f   : > { %379 = vadd.xlane.f32.xlu0 %v378_v20  ;;  %v381_v21 = vmul.f32 %v378_v20, %v378_v20 }
 0x153   : > { %382 = vadd.xlane.f32.xlu0 %v381_v21 }
 0x1dc   : > { %v380_v22 = vpop.xlane.xlu0 %379 }
 0x1dd   : > { %v384_v23 = vmul.f32 0.03125, %v380_v22 }
 0x1df   : > { %v386_v25 = vmul.f32 %v384_v23, %v384_v23  ;;  %v389_v30 = vsub.f32 %v378_v20, %v384_v23 }
 0x1e0   : > { %v383_v24 = vpop.xlane.xlu0 %382 }
 0x1e1   : > { %v385_v26 = vmul.f32 0.03125, %v383_v24 }
 0x1e3   : > { %v387_v27 = vsub.f32 %v385_v26, %v386_v25 }
 0x1e5   : > { %v388_v28 = vmax.f32 %v387_v27, 0.0 }
 0x1e7   : > { %v390_v29 = vadd.f32 1e-05, %v388_v28 }
 0x1e9   : > { %625 = vrsqrt.f32 %v390_v29 }
 0x1f3   : > { %v626_v31 = vpop.eup %625 }
 0x1f4   : > { %v392_v33 = vmul.f32 %v626_v31, %v389_v30 }
 0x1f6   : > { %v399_v35 = vmul.f32 %v521_v32, %v392_v33 }
 0x1f8   : > { %v406_v36 = vadd.f32 %v522_v34, %v399_v35 }
 0x1fa   : > { %407 = vst [vmem:[%s254_s12] sm:$0xff] %v406_v36 }
 0x1fb   : > { %698 = shalt.err (!%p695_p7)
}
 0x1fc   : > { %s699_s16 = scalar_lea.hbm %s959_s28, 128  ;;  %s703_s6 = scalar_lea.hbm %s1008_s5, 256 }
 0x1fd   : > { %p700_p9 = scmp.ne.s32.totalorder %s959_s28, %s699_s16  ;;  %p704_p0 = scmp.lt.u32.totalorder %s959_s28, %s1008_s5 }
 0x1fe   : > { %p705_p11 = scmp.lt.u32.totalorder %s703_s6, %s699_s16  ;;  %p707_p4 = scmp.lt.u32.totalorder %s699_s16, %s959_s28 }
 0x1ff   : > { %p701_p2 = pnand %p700_p9, %p885_p12 }
 0x200   : > { %p706_p1 = por %p705_p11, %p704_p0 }
 0x201   : > { %p702_p5 = pneg %p701_p2 }
 0x202   : > { %p708_p6 = por %p707_p4, %p706_p1 }
 0x204   : > { %p709_p8 = pnand %p708_p6, %p702_p5 }
 0x206   : > { %712 = shalt.err (!%p709_p8)
}
 0x207   : > { %562 = dma.vmem_to_hbm [thread:$0]  (%p885_p12), %s961_s10, 128, %s959_s28, %s409_s23  }
 0x208 PF: > { %s434_s11 = sand.u32 1, %s743_s18   ;;  %p1023_p10 = scmp.ne.s32.totalorder %s1013_s25, 0 }
 0x209   : > { %p1024_p13 = scmp.ge.s32.totalorder %s755_s21, 2  ;;  %s435_s12 = scalar_lea.sflag [#allocation4], %s434_s11 }
 0x20b   : > { %p573_p3 = pnand %p1024_p13, %p1023_p10 }
 0x20d   : > { %738 = dma.done.wait (!%p573_p3), %s435_s12, 128  }
 0x20e   : > { %740 = vsyncadd (!%p573_p3), %s435_s12, 4294967168  ;;  %p19_p7 = scmp.ge.s32.totalorder %s850_s30, 4   ;;  %s1025_s18 = smov %s747_s19 }
 0x20f   : > { %s1026_s19 = smov %s751_s20  ;;  %s1027_s20 = smov %s881_s8 }
 0x210   : > { %s1028_s21 = smov %s850_s30  ;;  %21 = sbr.rel (!%p19_p7) target bundleno = 6 (0x6), region = 89 }
 0x217   :  { %440 = vsyncpa [#allocation3], 1 }
 0x218   :  { %442 = vsyncpa [#allocation3 + $0x1], 1 }
 0x219   :  { %443 = vsyncpa [#allocation6], 1 }
 0x21a   :  { %444 = vsyncpa [#allocation4], 1 }
 0x21b   :  { %446 = vsyncpa [#allocation4 + $0x1], 1 }

</bundles_post_ra>
